<compile_context>
chip_gen: v7x
topology: tpu7x:2x2x1
jax: 0.10.0
libtpu: 0.0.40
codegen_flags: <defaults>
</compile_context>

<pallas_src>
import functools

import jax
import jax.numpy as jnp
from jax.experimental import pallas as pl
from jax.experimental.pallas import tpu as pltpu

_LANE = 128
_SUBLANE = 8


def _dice_kernel(x_ref, t_ref, out_ref, acc_ref, *, rows_total, r,
                 tiles_per_chunk):
    s_idx = pl.program_id(1)
    i = pl.program_id(2)

    @pl.when(i == 0)
    def _():
        acc_ref[...] = jnp.zeros_like(acc_ref)

    x = x_ref[0].astype(jnp.float32)   # (C, R, 128)
    t = t_ref[0].astype(jnp.float32)   # (C, R, 128)

    # Mask rows that fall past the true spatial extent (the last tile may
    # overhang the un-padded row axis).  Masking x as well as t keeps
    # exp/softmax finite on the garbage region, so no Inf/NaN can leak.
    row0 = (s_idx * tiles_per_chunk + i) * r
    row_ids = row0 + jax.lax.broadcasted_iota(jnp.int32, (r, _LANE), 0)
    valid = (row_ids < rows_total)[None]          # (1, R, 128)
    x = jnp.where(valid, x, 0.0)
    t = jnp.where(valid, t, 0.0)

    # Numerically-stable softmax over channels (axis 0).  Channel axis leading
    # => these reductions are plain elementwise VPU ops across C vregs.
    m = jnp.max(x, axis=0, keepdims=True)         # (1, R, 128)
    e = jnp.exp(x - m)                            # (C, R, 128)
    denom = jnp.sum(e, axis=0)                    # (R, 128)
    num = jnp.sum(e * t, axis=0)                  # (R, 128)
    tsum = jnp.sum(t, axis=0)                     # (R, 128)

    inter = num / denom                           # one exact divide per pixel

    # Partial-reduce into a single (8, 128) vreg each (VPU adds only); the full
    # cross-lane reduce runs once per (batch, split) chunk in the epilogue.
    acc_ref[0] += jnp.sum(inter.reshape(-1, _SUBLANE, _LANE), axis=0)
    acc_ref[1] += jnp.sum(tsum.reshape(-1, _SUBLANE, _LANE), axis=0)

    @pl.when(i == pl.num_programs(2) - 1)
    def _():
        out_ref[0, 0, 0] = jnp.sum(acc_ref[0])    # intersection partial
        out_ref[0, 0, 1] = jnp.sum(acc_ref[1])    # target-sum partial


def _vmem_capacity_bytes():
    try:
        info = pltpu.get_tpu_info()
        cap = getattr(info, "vmem_capacity_bytes", None)
        if cap:
            return int(cap)
    except Exception:
        pass
    return 64 << 20   # conservative fallback: smallest per-TC VMEM (v7x)


def dice_loss(inputs, targets, smooth=1.0):
    """inputs, targets: (N, C, H, W) logits / one-hot.  Returns scalar f32."""
    N, C, H, W = inputs.shape
    assert targets.shape == inputs.shape
    lsp = H * W

    rows = -(-lsp // _LANE)                  # ceil(lsp / 128)
    lane_pad = rows * _LANE - lsp            # < 128, only if lsp % 128 != 0

    x = inputs.reshape(N, C, lsp)
    t = targets.reshape(N, C, lsp)
    if lane_pad:
        # Unavoidable for the (rows, 128) reshape.  Zero logits give a finite
        # softmax and zero targets contribute nothing to intersection or
        # target-sum; the softmax-sum is analytic so it is never polluted.
        x = jnp.pad(x, ((0, 0), (0, 0), (0, lane_pad)))
        t = jnp.pad(t, ((0, 0), (0, 0), (0, lane_pad)))
    x = x.reshape(N, C, rows, _LANE)
    t = t.reshape(N, C, rows, _LANE)

    xi = x.dtype.itemsize
    ti = t.dtype.itemsize

    # --- Row-tile sizing: double-buffered (x, t) blocks plus ~4x f32
    # intermediates (x_f32 / e / e*t / slack) must fit physical VMEM with
    # headroom.  Cap at 2048 rows per tile.
    phys = _vmem_capacity_bytes()
    usable = max(24 << 20, min(int(phys * 0.70), 96 << 20))
    bytes_per_row = C * _LANE * (2 * (xi + ti) + 4 * 4)
    r_cap = max(_SUBLANE, (usable // bytes_per_row) // _SUBLANE * _SUBLANE)
    rows_ceil8 = -(-rows // _SUBLANE) * _SUBLANE
    r = max(_SUBLANE, min(2048, r_cap, rows_ceil8))

    n_tiles = -(-rows // r)

    # v7x has two TensorCores: give the parallel grid >= 2 units of work even
    # for N == 1 by splitting the row-tile range when it divides evenly.
    splits = 2 if (N == 1 and n_tiles >= 2 and n_tiles % 2 == 0) else 1
    tiles_per_chunk = n_tiles // splits

    blk_in = 2 * C * r * _LANE * (xi + ti)        # double-buffered inputs
    interm = 4 * C * r * _LANE * 4                # f32 temporaries
    vmem_limit = int(
        min(max(blk_in + interm + (6 << 20), 32 << 20),
            max(32 << 20, phys - (8 << 20)),
            100 << 20))

    kernel = functools.partial(
        _dice_kernel, rows_total=rows, r=r, tiles_per_chunk=tiles_per_chunk)

    in_map = lambda n, s, i: (n, 0, s * tiles_per_chunk + i, 0)

    partials = pl.pallas_call(
        kernel,
        out_shape=jax.ShapeDtypeStruct((N, splits, 2), jnp.float32),
        grid_spec=pltpu.PrefetchScalarGridSpec(
            num_scalar_prefetch=0,
            grid=(N, splits, tiles_per_chunk),
            in_specs=[
                pl.BlockSpec((1, C, r, _LANE), in_map),
                pl.BlockSpec((1, C, r, _LANE), in_map),
            ],
            out_specs=pl.BlockSpec(
                (1, 1, 2), lambda n, s, i: (n, s, 0),
                memory_space=pltpu.MemorySpace.SMEM),
            scratch_shapes=[pltpu.VMEM((2, _SUBLANE, _LANE), jnp.float32)],
        ),
        compiler_params=pltpu.CompilerParams(
            dimension_semantics=("parallel", "parallel", "arbitrary"),
            vmem_limit_bytes=vmem_limit,
        ),
    )(x, t)

    # TODO(synk): accepting int8 / class-index targets would roughly halve HBM
    # traffic, but the module spec takes dense float one-hot targets.
    intersection = jnp.sum(partials[..., 0])
    target_sum = jnp.sum(partials[..., 1])
    prob_sum = jnp.float32(N * lsp)   # each pixel's softmax sums to exactly 1
    dice = (2.0 * intersection + smooth) / (prob_sum + target_sum + smooth)
    return (1.0 - dice).astype(jnp.float32)


def _dice_loss_ref(inputs, targets, smooth=1.0):
    p = jax.nn.softmax(inputs.astype(jnp.float32), axis=1)
    t = targets.astype(jnp.float32)
    inter = jnp.sum(p * t)
    dice = (2.0 * inter + smooth) / (jnp.sum(p) + jnp.sum(t) + smooth)
    return 1.0 - dice


if __name__ == "__main__":
    key = jax.random.PRNGKey(0)
    k1, k2 = jax.random.split(key)

    N, C, H, W = 2, 4, 16, 16
    inputs = jax.random.normal(k1, (N, C, H, W), dtype=jnp.float32)
    labels = jax.random.randint(k2, (N, H, W), 0, C)
    targets = jnp.transpose(jax.nn.one_hot(labels, C, dtype=jnp.float32),
                            (0, 3, 1, 2))          # (N, C, H, W) one-hot

    out = jax.block_until_ready(dice_loss(inputs, targets, smooth=1.0))
    ref = _dice_loss_ref(inputs, targets, smooth=1.0)
    assert jnp.allclose(out, ref, atol=1e-5, rtol=1e-5), (out, ref)
    print("KERNEL_OK")
</pallas_src>

<mosaic_0001>
module attributes {stable_mosaic.version = 11 : i64} {
  func.func @_dice_kernel(%arg0: i32, %arg1: i32, %arg2: i32, %arg3: memref<1x4x8x128xf32, #tpu.memory_space<vmem>>, %arg4: memref<1x4x8x128xf32, #tpu.memory_space<vmem>>, %arg5: memref<1x1x2xf32, #tpu.memory_space<smem>>, %arg6: memref<2x8x128xf32, #tpu.memory_space<vmem>>) attributes {dimension_semantics = [#tpu.dimension_semantics<parallel>, #tpu.dimension_semantics<parallel>, #tpu.dimension_semantics<arbitrary>], iteration_bounds = array<i64: 2, 1, 1>, scalar_prefetch = 0 : i64, scratch_operands = 1 : i64, tpu.core_type = #tpu.core_type<tc>, window_params = [{transform_indices = @transform_0, window_bounds = array<i64: 1, 4, 8, 128>}, {transform_indices = @transform_1, window_bounds = array<i64: 1, 4, 8, 128>}, {transform_indices = @transform_2, window_bounds = array<i64: 1, 1, 2>}]} {
    %c0_i32 = arith.constant 0 : i32
    %0 = arith.cmpi eq, %arg2, %c0_i32 : i32
    %1 = arith.extui %0 : i1 to i32
    %c0_i32_0 = arith.constant 0 : i32
    %2 = arith.cmpi ne, %1, %c0_i32_0 : i32
    scf.if %2 {
      %cst_28 = arith.constant 0.000000e+00 : f32
      %53 = vector.broadcast %cst_28 : f32 to vector<2x8x128xf32>
      %c0_29 = arith.constant 0 : index
      %c0_30 = arith.constant 0 : index
      %c0_31 = arith.constant 0 : index
      %54 = vector.load %arg6[%c0_29, %c0_30, %c0_31] : memref<2x8x128xf32, #tpu.memory_space<vmem>>, vector<2x8x128xf32>
      tpu.vector_store %arg6[%c0_29, %c0_30, %c0_31], %53 {strides = array<i32>} : memref<2x8x128xf32, #tpu.memory_space<vmem>>, vector<2x8x128xf32>,
    } else {
    }
    %c0 = arith.constant 0 : index
    %c0_1 = arith.constant 0 : index
    %c0_2 = arith.constant 0 : index
    %c0_3 = arith.constant 0 : index
    %3 = vector.load %arg3[%c0, %c0_1, %c0_2, %c0_3] : memref<1x4x8x128xf32, #tpu.memory_space<vmem>>, vector<1x4x8x128xf32>
    %4 = vector.shape_cast %3 : vector<1x4x8x128xf32> to vector<4x8x128xf32>
    %c0_4 = arith.constant 0 : index
    %c0_5 = arith.constant 0 : index
    %c0_6 = arith.constant 0 : index
    %c0_7 = arith.constant 0 : index
    %5 = vector.load %arg4[%c0_4, %c0_5, %c0_6, %c0_7] : memref<1x4x8x128xf32, #tpu.memory_space<vmem>>, vector<1x4x8x128xf32>
    %6 = vector.shape_cast %5 : vector<1x4x8x128xf32> to vector<4x8x128xf32>
    %c1_i32 = arith.constant 1 : i32
    %7 = arith.muli %arg1, %c1_i32 : i32
    %8 = arith.addi %7, %arg2 : i32
    %c8_i32 = arith.constant 8 : i32
    %9 = arith.muli %8, %c8_i32 : i32
    %10 = tpu.iota {dimensions = array<i32: 0>} : vector<8x128xi32>
    %11 = vector.broadcast %9 : i32 to vector<8x128xi32>
    %12 = arith.addi %11, %10 : vector<8x128xi32>
    %c2_i32 = arith.constant 2 : i32
    %13 = vector.broadcast %c2_i32 : i32 to vector<8x128xi32>
    %14 = arith.cmpi slt, %12, %13 : vector<8x128xi32>
    %15 = vector.shape_cast %14 : vector<8x128xi1> to vector<1x8x128xi1>
    %cst = arith.constant 0.000000e+00 : f32
    %16 = vector.shape_cast %15 : vector<1x8x128xi1> to vector<1x8x128xi1>
    %17 = vector.broadcast %16 : vector<1x8x128xi1> to vector<4x8x128xi1>
    %18 = vector.broadcast %cst : f32 to vector<4x8x128xf32>
    %19 = arith.select %17, %4, %18 : vector<4x8x128xi1>, vector<4x8x128xf32>
    %cst_8 = arith.constant 0.000000e+00 : f32
    %20 = vector.shape_cast %15 : vector<1x8x128xi1> to vector<1x8x128xi1>
    %21 = vector.broadcast %20 : vector<1x8x128xi1> to vector<4x8x128xi1>
    %22 = vector.broadcast %cst_8 : f32 to vector<4x8x128xf32>
    %23 = arith.select %21, %6, %22 : vector<4x8x128xi1>, vector<4x8x128xf32>
    %cst_9 = arith.constant dense<0xFF800000> : vector<8x128xf32>
    %24 = vector.multi_reduction <maximumf>, %19, %cst_9 [0] : vector<4x8x128xf32> to vector<8x128xf32>
    %25 = vector.shape_cast %24 : vector<8x128xf32> to vector<1x8x128xf32>
    %26 = vector.broadcast %25 : vector<1x8x128xf32> to vector<4x8x128xf32>
    %27 = arith.subf %19, %26 : vector<4x8x128xf32>
    %28 = math.exp %27 : vector<4x8x128xf32>
    %cst_10 = arith.constant dense<0.000000e+00> : vector<8x128xf32>
    %29 = vector.multi_reduction <add>, %28, %cst_10 [0] : vector<4x8x128xf32> to vector<8x128xf32>
    %30 = arith.mulf %28, %23 : vector<4x8x128xf32>
    %cst_11 = arith.constant dense<0.000000e+00> : vector<8x128xf32>
    %31 = vector.multi_reduction <add>, %30, %cst_11 [0] : vector<4x8x128xf32> to vector<8x128xf32>
    %cst_12 = arith.constant dense<0.000000e+00> : vector<8x128xf32>
    %32 = vector.multi_reduction <add>, %23, %cst_12 [0] : vector<4x8x128xf32> to vector<8x128xf32>
    %33 = arith.divf %31, %29 : vector<8x128xf32>
    %c0_13 = arith.constant 0 : index
    %c0_14 = arith.constant 0 : index
    %c0_15 = arith.constant 0 : index
    %34 = vector.load %arg6[%c0_13, %c0_14, %c0_15] : memref<2x8x128xf32, #tpu.memory_space<vmem>>, vector<1x8x128xf32>
    %35 = vector.shape_cast %34 : vector<1x8x128xf32> to vector<8x128xf32>
    %36 = vector.shape_cast %33 : vector<8x128xf32> to vector<1x8x128xf32>
    %cst_16 = arith.constant dense<0.000000e+00> : vector<8x128xf32>
    %37 = vector.multi_reduction <add>, %36, %cst_16 [0] : vector<1x8x128xf32> to vector<8x128xf32>
    %38 = arith.addf %35, %37 : vector<8x128xf32>
    %c0_17 = arith.constant 0 : index
    %c0_18 = arith.constant 0 : index
    %c0_19 = arith.constant 0 : index
    %39 = vector.load %arg6[%c0_17, %c0_18, %c0_19] : memref<2x8x128xf32, #tpu.memory_space<vmem>>, vector<1x8x128xf32>
    %40 = vector.shape_cast %39 : vector<1x8x128xf32> to vector<8x128xf32>
    %41 = vector.shape_cast %38 : vector<8x128xf32> to vector<1x8x128xf32>
    tpu.vector_store %arg6[%c0_17, %c0_18, %c0_19], %41 {strides = array<i32>} : memref<2x8x128xf32, #tpu.memory_space<vmem>>, vector<1x8x128xf32>,
    %c1 = arith.constant 1 : index
    %c0_20 = arith.constant 0 : index
    %c0_21 = arith.constant 0 : index
    %42 = vector.load %arg6[%c1, %c0_20, %c0_21] : memref<2x8x128xf32, #tpu.memory_space<vmem>>, vector<1x8x128xf32>
    %43 = vector.shape_cast %42 : vector<1x8x128xf32> to vector<8x128xf32>
    %44 = vector.shape_cast %32 : vector<8x128xf32> to vector<1x8x128xf32>
    %cst_22 = arith.constant dense<0.000000e+00> : vector<8x128xf32>
    %45 = vector.multi_reduction <add>, %44, %cst_22 [0] : vector<1x8x128xf32> to vector<8x128xf32>
    %46 = arith.addf %43, %45 : vector<8x128xf32>
    %c1_23 = arith.constant 1 : index
    %c0_24 = arith.constant 0 : index
    %c0_25 = arith.constant 0 : index
    %47 = vector.load %arg6[%c1_23, %c0_24, %c0_25] : memref<2x8x128xf32, #tpu.memory_space<vmem>>, vector<1x8x128xf32>
    %48 = vector.shape_cast %47 : vector<1x8x128xf32> to vector<8x128xf32>
    %49 = vector.shape_cast %46 : vector<8x128xf32> to vector<1x8x128xf32>
    tpu.vector_store %arg6[%c1_23, %c0_24, %c0_25], %49 {strides = array<i32>} : memref<2x8x128xf32, #tpu.memory_space<vmem>>, vector<1x8x128xf32>,
    %c0_i32_26 = arith.constant 0 : i32
    %50 = arith.cmpi eq, %arg2, %c0_i32_26 : i32
    %51 = arith.extui %50 : i1 to i32
    %c0_i32_27 = arith.constant 0 : i32
    %52 = arith.cmpi ne, %51, %c0_i32_27 : i32
    scf.if %52 {
      %c0_28 = arith.constant 0 : index
      %c0_29 = arith.constant 0 : index
      %c0_30 = arith.constant 0 : index
      %53 = vector.load %arg6[%c0_28, %c0_29, %c0_30] : memref<2x8x128xf32, #tpu.memory_space<vmem>>, vector<1x8x128xf32>
      %54 = vector.shape_cast %53 : vector<1x8x128xf32> to vector<8x128xf32>
      %55 = vector.shape_cast %54 : vector<8x128xf32> to vector<1x8x128xf32>
      %cst_31 = arith.constant dense<0.000000e+00> : vector<1xf32>
      %56 = vector.multi_reduction <add>, %55, %cst_31 [1, 2] : vector<1x8x128xf32> to vector<1xf32>
      %57 = vector.shape_cast %56 : vector<1xf32> to vector<1x1x1xf32>
      %58 = vector.extract %57[0, 0, 0] : f32 from vector<1x1x1xf32>
      %c0_32 = arith.constant 0 : index
      %c0_33 = arith.constant 0 : index
      %c0_34 = arith.constant 0 : index
      %59 = memref.load %arg5[%c0_32, %c0_33, %c0_34] : memref<1x1x2xf32, #tpu.memory_space<smem>>
      memref.store %58, %arg5[%c0_32, %c0_33, %c0_34] : memref<1x1x2xf32, #tpu.memory_space<smem>>
      %c1_35 = arith.constant 1 : index
      %c0_36 = arith.constant 0 : index
      %c0_37 = arith.constant 0 : index
      %60 = vector.load %arg6[%c1_35, %c0_36, %c0_37] : memref<2x8x128xf32, #tpu.memory_space<vmem>>, vector<1x8x128xf32>
      %61 = vector.shape_cast %60 : vector<1x8x128xf32> to vector<8x128xf32>
      %62 = vector.shape_cast %61 : vector<8x128xf32> to vector<1x8x128xf32>
      %cst_38 = arith.constant dense<0.000000e+00> : vector<1xf32>
      %63 = vector.multi_reduction <add>, %62, %cst_38 [1, 2] : vector<1x8x128xf32> to vector<1xf32>
      %64 = vector.shape_cast %63 : vector<1xf32> to vector<1x1x1xf32>
      %65 = vector.extract %64[0, 0, 0] : f32 from vector<1x1x1xf32>
      %c0_39 = arith.constant 0 : index
      %c0_40 = arith.constant 0 : index
      %c1_41 = arith.constant 1 : index
      %66 = memref.load %arg5[%c0_39, %c0_40, %c1_41] : memref<1x1x2xf32, #tpu.memory_space<smem>>
      memref.store %65, %arg5[%c0_39, %c0_40, %c1_41] : memref<1x1x2xf32, #tpu.memory_space<smem>>
    } else {
    }
    return
  }
  func.func @transform_0(%arg0: i32, %arg1: i32, %arg2: i32) -> (i32, i32, i32, i32) {
    %c1_i32 = arith.constant 1 : i32
    %0 = arith.muli %arg1, %c1_i32 : i32
    %1 = arith.addi %0, %arg2 : i32
    %c0_i32 = arith.constant 0 : i32
    %c0_i32_0 = arith.constant 0 : i32
    %c0_i32_1 = arith.constant 0 : i32
    return %arg0, %c0_i32, %1, %c0_i32_0 : i32, i32, i32, i32
  }
  func.func @transform_1(%arg0: i32, %arg1: i32, %arg2: i32) -> (i32, i32, i32, i32) {
    %c1_i32 = arith.constant 1 : i32
    %0 = arith.muli %arg1, %c1_i32 : i32
    %1 = arith.addi %0, %arg2 : i32
    %c0_i32 = arith.constant 0 : i32
    %c0_i32_0 = arith.constant 0 : i32
    %c0_i32_1 = arith.constant 0 : i32
    return %arg0, %c0_i32, %1, %c0_i32_0 : i32, i32, i32, i32
  }
  func.func @transform_2(%arg0: i32, %arg1: i32, %arg2: i32) -> (i32, i32, i32) {
    %c0_i32 = arith.constant 0 : i32
    %c0_i32_0 = arith.constant 0 : i32
    return %arg0, %arg1, %c0_i32 : i32, i32, i32
  }
}

</mosaic_0001>

<bundles_post_ra>
// kernel: tpu_custom_call.1
= control target key start
LH: loop header
LB: loop body
LE: loop exit
PB: predicated region body
PF: predicated region fallthrough
CT: control target
= control target key end

     0   :  { %7 = vsyncpa [#allocation4], 0  ;;  %s875_s0 = inlined_call_operand.hbm [shape: f32[2,4,2,128], index: 0, kind: input, shape index: {}]   ;;  %s876_s1 = inlined_call_operand.hbm [shape: f32[2,4,2,128], index: 1, kind: input, shape index: {}]   ;;  %s877_s2 = inlined_call_operand.hbm [shape: f32[2,1,2], index: 2, kind: output, shape index: {}]  }
   0x1   :  { %9 = vsyncpa [#allocation4 + $0x1], 0 }
   0x2   :  { %10 = vsyncpa [#allocation7], 0 }
   0x3   :  { %12 = vsyncpa [#allocation7 + $0x1], 0 }
   0x4   :  { %13 = vsyncpa [#allocation5], 0 }
   0x5   :  { %15 = vsyncpa [#allocation5 + $0x1], 0  ;;  %s728_s9 = smov 0   ;;  %s730_s10 = smov 0  }
   0x6   :  { %s732_s11 = smov 0   ;;  %s734_s12 = smov 0  }
   0x7   :  { %s736_s13 = smov 0   ;;  %s738_s14 = smov 0  }
   0x8 LB: > { %s529_s15 = sadd.s32 4294967295, %s701_s14   ;;  %s530_s16 = sadd.s32 4294967294, %s701_s14   ;;  %s701_s14 = sphi %s738_s14, %s21_s14   ;;  %s697_s13 = sphi %s736_s13, %s886_s13   ;;  %s693_s12 = sphi %s734_s12, %s885_s12   ;;  %s689_s11 = sphi %s732_s11, %s884_s11   ;;  %s685_s10 = sphi %s730_s10, %s883_s10   ;;  %s681_s9 = sphi %s728_s9, %s882_s9  }
   0x9   : > { %s40_s17 = sadd.s32 1, %s697_s13  ;;  %s51_s18 = sadd.s32 1, %s689_s11 }
   0xa   : > { %p42_p0 = scmp.ge.s32.totalorder %s40_s17, 2  ;;  %p58_p1 = scmp.ne.s32.totalorder %s689_s11, %s685_s10 }
   0xb   : > { %p59_p2 = scmp.eq.s32.totalorder %s701_s14, 0  ;;  %p64_p3 = scmp.ne.s32.totalorder %s685_s10, %s681_s9 }
   0xc   : > { %s888_s17 = smov (%p42_p0, %s40_s17), 0  ;;  %p65_p5 = scmp.eq.s32.totalorder %s529_s15, 0 }
   0xd   : > { %p769_p4 = por %p59_p2, %p58_p1  ;;  %s46_s20 = ssub.s32 %s697_s13, %s888_s17 }
   0xe   : > { %p120_p6 = scmp.eq.s32.totalorder %s529_s15, 1  ;;  %p49_p7 = scmp.eq.s32.totalorder %s46_s20, 0 }
   0xf   : > { %p775_p8 = por %p65_p5, %p64_p3  ;;  %p126_p10 = scmp.eq.s32.totalorder %s530_s16, 1 }
  0x10   : > { %p779_p9 = por %p120_p6, %p58_p1  ;;  %p532_p12 = scmp.ge.s32.totalorder %s701_s14, 2 }
  0x11   : > { %s784_s23 = scalar_select %p49_p7, %s689_s11, %s51_s18  }
  0x12   : > { %p786_p11 = por %p126_p10, %p64_p3  ;;  %142 = sbr.rel (%p532_p12) target bundleno = 65 (0x41), region = 16 }
  0x19   : > { %145 = sbr.rel (!%p769_p4) target bundleno = 45 (0x2d), region = 20 }
  0x20   : > { %s146_s25 = sand.u32 1, %s689_s11  }
  0x21   : > { %s533_s26 = sshll.u32 %s146_s25, 5  ;;  %s147_s27 = scalar_lea.sflag [#allocation4], %s146_s25 }
  0x22   : > { %s150_s28 = scalar_lea.vmem [#allocation3], %s533_s26 }
  0x23   : > { %157 = vsyncadd %s147_s27, 384  ;;  %s551_s29 = sshll.u32 %s697_s13, 7  ;;  %s169_s30 = sld [smem:[#allocation0]]  }
  0x24   : > { %s162_s5 = scalar_lea.hbm %s875_s0, %s551_s29  ;;  %s177_s6 = sshll.u32 %s150_s28, 4  ;;  %s178_s6 = int_to_ptr.vmem [resolvable:$true] %s177_s6 }
  0x25   : > { %s703_s7 = smov 32   ;;  %s704_s8 = smov 128  }
  0x26   : > { %184 = sst [smem:[#allocation10]] %s703_s7  ;;  %s705_s15 = smov 1  }
  0x27   : > { %186 = sst [smem:[#allocation10 + $0x1]] %s704_s8  ;;  %s706_s20 = smov 2  }
  0x28   : > { %188 = sst [smem:[#allocation10 + $0x2]] %s705_s15  ;;  %s707_s25 = smov [#allocation9]  }
  0x29   : > { %s536_s16 = sshll.u32 %s169_s30, 26  ;;  %190 = sst [smem:[#allocation10 + $0x3]] %s703_s7 }
  0x2a   : > { %s537_s18 = sadd.s32 134217728, %s536_s16  ;;  %192 = sst [smem:[#allocation10 + $0x4]] %s703_s7 }
  0x2b   : > { %194 = sst [smem:[#allocation10 + $0x5]] %s706_s20 }
  0x2c   : > { %196 = dma.general %s162_s5, 128, %s178_s6, %s147_s27, %s707_s25, [#allocation10], %s537_s18, 0  }
  0x2d PF: > { %199 = sbr.rel (!%p769_p4) target bundleno = 65 (0x41), region = 24 }
  0x34   : > { %s200_s26 = sand.u32 1, %s689_s11  }
  0x35   : > { %s538_s28 = sshll.u32 %s200_s26, 5  ;;  %s201_s29 = scalar_lea.sflag [#allocation7], %s200_s26 }
  0x36   : > { %s204_s3 = scalar_lea.vmem [#allocation6], %s538_s28 }
  0x37   : > { %211 = vsyncadd %s201_s29, 384  ;;  %s552_s4 = sshll.u32 %s697_s13, 7  ;;  %s223_s30 = sld [smem:[#allocation0]]  }
  0x38   : > { %s216_s7 = scalar_lea.hbm %s876_s1, %s552_s4  ;;  %s231_s16 = sshll.u32 %s204_s3, 4  ;;  %s232_s16 = int_to_ptr.vmem [resolvable:$true] %s231_s16 }
  0x39   : > { %s708_s27 = smov 32   ;;  %s709_s5 = smov 128  }
  0x3a   : > { %238 = sst [smem:[#allocation12]] %s708_s27  ;;  %s710_s19 = smov 1  }
  0x3b   : > { %240 = sst [smem:[#allocation12 + $0x1]] %s709_s5  ;;  %s711_s20 = smov 2  }
  0x3c   : > { %242 = sst [smem:[#allocation12 + $0x2]] %s710_s19  ;;  %s712_s25 = smov [#allocation11]  }
  0x3d   : > { %s541_s6 = sshll.u32 %s223_s30, 26  ;;  %244 = sst [smem:[#allocation12 + $0x3]] %s708_s27 }
  0x3e   : > { %s542_s18 = sadd.s32 134217728, %s541_s6  ;;  %246 = sst [smem:[#allocation12 + $0x4]] %s708_s27 }
  0x3f   : > { %248 = sst [smem:[#allocation12 + $0x5]] %s711_s20 }
  0x40   : > { %250 = dma.general %s216_s7, 128, %s232_s16, %s201_s29, %s712_s25, [#allocation12], %s542_s18, 0  }
  0x41 PF: > { %p543_p13 = scmp.ge.s32.totalorder %s701_s14, 1  ;;  %p252_p0 = scmp.lt.s32.totalorder %s701_s14, 3 }
  0x43   : > { %p253_p1 = pnand %p543_p13, %p252_p0 }
  0x44   : > { %s808_s26 = sand.u32 (!%p253_p1), 1, %s685_s10  }
  0x45   : > { %256 = sbr.rel (%p253_p1) target bundleno = 335 (0x14f), region = 28  ;;  %s544_s28 = sshll.u32 (!%p253_p1), %s808_s26, 5 }
  0x46   : > { %s259_s3 = scalar_lea.sflag (!%p253_p1), [#allocation4], %s808_s26  ;;  %s262_s4 = scalar_lea.vmem (!%p253_p1), [#allocation3], %s544_s28 }
  0x4c   : > { %668 = dma.done.wait (%p775_p8), %s259_s3, 512  }
  0x4d   : > { %670 = vsyncadd (%p775_p8), %s259_s3, 4294966784  ;;  %s268_s29 = scalar_lea.sflag [#allocation7], %s808_s26  ;;  %s817_s30 = scalar_lea.vmem [#allocation6], %s544_s28 }
  0x4e   : > { %672 = dma.done.wait (%p775_p8), %s268_s29, 512  }
  0x4f   : > { %674 = vsyncadd (%p775_p8), %s268_s29, 4294966784  ;;  %v321_v0 = vlaneseq  ;;  %v311_v2 = vld [vmem:[%s262_s4] sm:$0xff]  ;;  %v312_v3 = vld [vmem:[%s262_s4 + $0x8] sm:$0xff]  ;;  %s546_s21 = sshll.u32 %s808_s26, 7  ;;  %s548_s15 = sshll.u32 %s693_s12, 4 }
  0x50   : > { %v313_v4 = vld [vmem:[%s262_s4 + $0x10] sm:$0xff]  ;;  %v314_v5 = vld [vmem:[%s262_s4 + $0x18] sm:$0xff]  ;;  %v315_v21 = vld [vmem:[%s817_s30] sm:$0xff]  ;;  %s296_s7 = scalar_lea.smem [#allocation8], %s546_s21  ;;  %s415_s19 = scalar_lea.hbm %s877_s2, %s548_s15 }
  0x51   : > { %v322_v1 = vshrl.u32 %v321_v0, 7  ;;  %v316_v22 = vld [vmem:[%s817_s30 + $0x8] sm:$0xff]  ;;  %v317_v27 = vld [vmem:[%s817_s30 + $0x10] sm:$0xff]  ;;  %v318_v35 = vld [vmem:[%s817_s30 + $0x18] sm:$0xff]  ;;  %s400_s16 = scalar_lea.smem %s296_s7, 1 [#allocation8]  ;;  %s403_s18 = scalar_lea.sflag [#allocation5], %s808_s26 }
  0x52   : > { %s629_s20 = scalar_lea.hbm %s415_s19, 16  ;;  %s633_s3 = scalar_lea.hbm %s877_s2, 32 }
  0x53   : > { %vm325_vm0 = vcmp.lt.s32.totalorder %v322_v1, 2  ;;  %p630_p2 = scmp.ne.s32.totalorder %s415_s19, %s629_s20  ;;  %p634_p5 = scmp.lt.u32.totalorder %s415_s19, %s877_s2 }
  0x54   : > { %v328_v6 = vsel %vm325_vm0, %v311_v2, 0.0  ;;  %v329_v7 = vsel %vm325_vm0, %v312_v3, 0.0  ;;  %v330_v8 = vsel %vm325_vm0, %v313_v4, 0.0  ;;  %v331_v9 = vsel %vm325_vm0, %v314_v5, 0.0  ;;  %p635_p6 = scmp.lt.u32.totalorder %s633_s3, %s629_s20  ;;  %p637_p8 = scmp.lt.u32.totalorder %s629_s20, %s415_s19 }
  0x55   : > { %v336_v10 = vmax.f32 %v328_v6, %v329_v7  ;;  %v337_v11 = vmax.f32 %v330_v8, %v331_v9  ;;  %v332_v24 = vsel %vm325_vm0, %v315_v21, 0.0  ;;  %v333_v25 = vsel %vm325_vm0, %v316_v22, 0.0  ;;  %p631_p3 = pnand %p630_p2, %p779_p9 }
  0x56   : > { %v334_v33 = vsel %vm325_vm0, %v317_v27, 0.0  ;;  %v335_v39 = vsel %vm325_vm0, %v318_v35, 0.0  ;;  %v361_v42 = vadd.f32 %v333_v25, %v332_v24  ;;  %p636_p7 = por %p635_p6, %p634_p5 }
  0x57   : > { %v338_v12 = vmax.f32 %v336_v10, %v337_v11  ;;  %p632_p4 = pneg %p631_p3 }
  0x58   : > { %v362_v44 = vadd.f32 %v361_v42, %v334_v33  ;;  %p638_p10 = por %p637_p8, %p636_p7 }
  0x59   : > { %v339_v13 = vsub.f32 %v328_v6, %v338_v12  ;;  %v340_v14 = vsub.f32 %v329_v7, %v338_v12  ;;  %v341_v15 = vsub.f32 %v330_v8, %v338_v12  ;;  %v342_v16 = vsub.f32 %v331_v9, %v338_v12 }
  0x5a   : > { %v363_v47 = vadd.f32 %v362_v44, %v335_v39  ;;  %p639_p12 = pnand %p638_p10, %p632_p4 }
  0x5b   : > { %v343_v17 = vmul.f32 1.442695, %v339_v13  ;;  %v345_v18 = vmul.f32 1.442695, %v340_v14  ;;  %v347_v19 = vmul.f32 1.442695, %v341_v15 }
  0x5c   : > { %v349_v20 = vmul.f32 1.442695, %v342_v16 }
  0x5d   : > { %619 = vpow2.f32 %v343_v17 }
  0x5e   : > { %621 = vpow2.f32 %v345_v18 }
  0x5f   : > { %623 = vpow2.f32 %v347_v19 }
  0x60   : > { %625 = vpow2.f32 %v349_v20 }
  0x67   : > { %v620_v23 = vpop.eup %619 }
  0x68   : > { %v622_v26 = vpop.eup %621  ;;  %v354_v31 = vmul.f32 %v620_v23, %v332_v24 }
  0x69   : > { %v624_v28 = vpop.eup %623  ;;  %v351_v29 = vadd.f32 %v622_v26, %v620_v23  ;;  %v355_v32 = vmul.f32 %v622_v26, %v333_v25 }
  0x6a   : > { %v626_v30 = vpop.eup %625  ;;  %v356_v37 = vmul.f32 %v624_v28, %v334_v33 }
  0x6b   : > { %v352_v34 = vadd.f32 %v624_v28, %v351_v29  ;;  %v358_v38 = vadd.f32 %v355_v32, %v354_v31  ;;  %v357_v40 = vmul.f32 %v626_v30, %v335_v39 }
  0x6d   : > { %v353_v36 = vadd.f32 %v626_v30, %v352_v34  ;;  %v359_v41 = vadd.f32 %v358_v38, %v356_v37 }
  0x6f   : > { %627 = vrcp.f32 %v353_v36  ;;  %v360_v43 = vadd.f32 %v359_v41, %v357_v40 }
  0x79   : > { %v628_v45 = vpop.eup %627 }
  0x7a   : > { %v365_v46 = vmul.f32 %v628_v45, %v360_v43 }
  0x7c   : > { %379 = vadd.xlane.f32.xlu0 %v365_v46 }
  0x80   : > { %391 = vadd.xlane.f32.xlu0 %v363_v47 }
 0x109   : > { %v380_v48 = vpop.xlane.xlu0 %379 }
 0x10a   : > { %v381_v49 = vrot.slane %v380_v48, 4 }
 0x10c   : > { %v382_v50 = vadd.f32 %v381_v49, %v380_v48 }
 0x10d   : > { %v392_v51 = vpop.xlane.xlu0 %391 }
 0x10e   : > { %v383_v52 = vrot.slane %v382_v50, 2  ;;  %v393_v53 = vrot.slane %v392_v51, 4 }
 0x110   : > { %v394_v54 = vadd.f32 %v393_v53, %v392_v51  ;;  %v384_v55 = vadd.f32 %v383_v52, %v382_v50 }
 0x112   : > { %v395_v56 = vrot.slane %v394_v54, 2  ;;  %v385_v57 = vrot.slane %v384_v55, 1 }
 0x114   : > { %v396_v58 = vadd.f32 %v395_v56, %v394_v54  ;;  %v386_v59 = vadd.f32 %v385_v57, %v384_v55 }
 0x116   : > { %553 = vpush %v386_v59  ;;  %v397_v60 = vrot.slane %v396_v58, 1 }
 0x118   : > { %v398_v61 = vadd.f32 %v397_v60, %v396_v58 }
 0x11a   : > { %555 = vpush %v398_v61 }
 0x147   : > { %s554_s8 = spop %553 }
 0x148   : > { %389 = sst [smem:[%s296_s7]] %s554_s8 }
 0x14b   : > { %s556_s6 = spop %555 }
 0x14c   : > { %401 = sst [smem:[%s400_s16]] %s556_s6 }
 0x14d   : > { %642 = shalt.err (!%p639_p12)
}
 0x14e   : > { %559 = dma.smem_to_hbm (%p779_p9), %s296_s7, 16, %s415_s19, %s403_s18  }
 0x14f PF: > { %p550_p13 = scmp.lt.s32.totalorder %s701_s14, 2 }
 0x150   : > { %s427_s26 = sand.u32 (!%p550_p13), 1, %s681_s9  }
 0x151   : > { %422 = sbr.rel (%p550_p13) target bundleno = 347 (0x15b), region = 52  ;;  %s428_s29 = scalar_lea.sflag (!%p550_p13), [#allocation5], %s427_s26 }
 0x158   : > { %676 = dma.done.wait (%p786_p11), %s428_s29, 16  }
 0x159   : > { %678 = vsyncadd (%p786_p11), %s428_s29, 4294967280 }
 0x15a   : > { %433 = sfence }
 0x15b PF: > { %s21_s14 = sadd.s32 1, %s701_s14   ;;  %s882_s9 = smov %s685_s10 }
 0x15c   : > { %p18_p0 = scmp.ge.s32.totalorder %s21_s14, 4   ;;  %s883_s10 = smov %s689_s11 }
 0x15d   : > { %s884_s11 = smov %s784_s23  ;;  %s885_s12 = smov %s697_s13 }
 0x15e   : > { %s886_s13 = smov %s888_s17  ;;  %20 = sbr.rel (!%p18_p0) target bundleno = 8 (0x8), region = 107 }
 0x165   :  { %434 = vsyncpa [#allocation4], 1 }
 0x166   :  { %436 = vsyncpa [#allocation4 + $0x1], 1 }
 0x167   :  { %437 = vsyncpa [#allocation7], 1 }
 0x168   :  { %439 = vsyncpa [#allocation7 + $0x1], 1 }
 0x169   :  { %440 = vsyncpa [#allocation5], 1 }
 0x16a   :  { %442 = vsyncpa [#allocation5 + $0x1], 1 }

</bundles_post_ra>
